<compile_context>
chip_gen: v7x
topology: tpu7x:2x2x1
jax: 0.10.0
libtpu: 0.0.40
codegen_flags: <defaults>
</compile_context>

<pallas_src>
import functools

import jax
import jax.numpy as jnp
from jax import lax
from jax.experimental import pallas as pl
from jax.experimental.pallas import tpu as pltpu

IN_DIM, H1, H2, OUT_DIM = 5, 64, 32, 1

DEFAULT_B_TILE = 32 * 1024   # batch rows per grid step (review: 32K-64K)
DEFAULT_CHUNK = 512          # batch lanes per inner-loop step (multiple of 128)


def _cdiv(a, b):
    return -(-a // b)


def _round_up(a, m):
    return _cdiv(a, m) * m


def _choose_tiling(batch, b_tile_max, chunk):
    """Pick (n_tiles, b_tile): tiles as big as b_tile_max (amortizes the
    ~0.35 us fixed per-grid-step cost), but at least two (even) tiles once
    there is enough work so the "parallel" grid axis spans both TensorCores on
    v7x.  b_tile is a multiple of `chunk`, so padding waste is <= n_tiles*chunk
    rows (negligible for large batches)."""
    n_tiles = max(1, _cdiv(batch, b_tile_max))
    if batch >= 4 * chunk:                 # enough work to split across 2 TCs
        n_tiles = max(n_tiles, 2)
        n_tiles += n_tiles % 2             # keep the tile count even
    b_tile = _round_up(_cdiv(batch, n_tiles), chunk)
    return n_tiles, b_tile


def mlp_kernel(xt_ref, w1_ref, b1_ref, w2_ref, b2_ref, w3_ref, b3_ref, o_ref,
               *, chunk):
    """One batch tile.  Batch-on-lanes layout: xt is (IN_DIM, b_tile), all
    intermediates and the (1, b_tile) output are lane-dense, and the MXU
    streams the tiny weight matrices (small M) across wide N."""
    b_tile = o_ref.shape[-1]
    n_chunks = b_tile // chunk

    # Weights/biases are tiny and resident (constant index_maps); load once per
    # batch tile.  Biases stay (H, 1) and lane-broadcast at the add -- no
    # materialized (H, chunk) broadcast constants.
    w1 = w1_ref[...]                 # (H1, IN_DIM)   compute dtype (f32 / bf16)
    w2 = w2_ref[...]                 # (H2, H1)       f32
    w3 = w3_ref[...]                 # (OUT_DIM, H2)  f32
    b1 = b1_ref[...]                 # (H1, 1)        f32
    b2 = b2_ref[...]                 # (H2, 1)        f32
    b3 = b3_ref[...]                 # (OUT_DIM, 1)   f32

    def body(c, carry):
        start = pl.multiple_of(c * chunk, chunk)
        x = xt_ref[:, pl.ds(start, chunk)]          # (IN_DIM, chunk), batch on lanes
        h1 = jnp.maximum(
            jnp.dot(w1, x, preferred_element_type=jnp.float32) + b1, 0.0)
        # dropout1: identity (eval mode)
        h2 = jnp.maximum(
            jnp.dot(w2, h1, preferred_element_type=jnp.float32) + b2, 0.0)
        # dropout2: identity (eval mode)
        o = jnp.dot(w3, h2, preferred_element_type=jnp.float32) + b3
        o_ref[:, pl.ds(start, chunk)] = o.astype(o_ref.dtype)   # lane-dense store
        return carry

    # Partial unroll: avoids code bloat / long compiles at large tiles while
    # keeping scheduling visibility (review item).
    lax.fori_loop(0, n_chunks, body, 0, unroll=min(n_chunks, 4))


def price_prediction_forward_feature_major(xt, params, *,
                                           b_tile_max=DEFAULT_B_TILE,
                                           chunk=DEFAULT_CHUNK,
                                           compute_dtype=jnp.float32):
    """xt: (IN_DIM, B) feature-major input (preferred upstream layout: skips
    the HBM transpose pass of the row-major entry point).  Returns (B, 1) f32."""
    assert xt.ndim == 2 and xt.shape[0] == IN_DIM
    assert chunk % 128 == 0
    B = xt.shape[1]
    w1, b1, w2, b2, w3, b3 = params

    n_tiles, b_tile = _choose_tiling(B, b_tile_max, chunk)
    b_pad = n_tiles * b_tile

    # Double-buffered, 8-sublane-padded input + output tiles must fit with
    # headroom under the explicit VMEM limit (v5e default scoped limit is only
    # 16 MiB; v7x physical VMEM is 64 MiB).
    vmem_limit = 32 * 1024 * 1024
    io_bytes = 2 * 8 * b_tile * (jnp.dtype(compute_dtype).itemsize + 4)
    assert io_bytes <= vmem_limit - (8 << 20), (
        "I/O tiles too large for the VMEM budget; lower b_tile_max or raise "
        "vmem_limit_bytes")

    xt = xt.astype(compute_dtype)
    if b_pad != B:
        xt = jnp.pad(xt, ((0, 0), (0, b_pad - B)))

    out = pl.pallas_call(
        functools.partial(mlp_kernel, chunk=chunk),
        out_shape=jax.ShapeDtypeStruct((OUT_DIM, b_pad), jnp.float32),
        grid=(n_tiles,),
        in_specs=[
            pl.BlockSpec((IN_DIM, b_tile), lambda i: (0, i)),   # streamed x tile
            pl.BlockSpec((H1, IN_DIM), lambda i: (0, 0)),       # resident weights
            pl.BlockSpec((H1, 1), lambda i: (0, 0)),            # and biases
            pl.BlockSpec((H2, H1), lambda i: (0, 0)),
            pl.BlockSpec((H2, 1), lambda i: (0, 0)),
            pl.BlockSpec((OUT_DIM, H2), lambda i: (0, 0)),
            pl.BlockSpec((OUT_DIM, 1), lambda i: (0, 0)),
        ],
        out_specs=pl.BlockSpec((OUT_DIM, b_tile), lambda i: (0, i)),  # lane-dense
        compiler_params=pltpu.CompilerParams(
            dimension_semantics=("parallel",),   # megacore sharding on v7x
            vmem_limit_bytes=vmem_limit,
        ),
    )(xt, w1.astype(compute_dtype), b1, w2, b2, w3, b3)

    # (1, b_pad) -> (b_pad, 1) is a free reshape (same linear order); drop pad.
    return out.reshape(b_pad, OUT_DIM)[:B]


def price_prediction_forward(x, params, **kwargs):
    """x: (B, IN_DIM) float32 (PyTorch layout).  Returns (B, 1) float32.

    The row-major contract costs one transpose/pad pass over x (~40 B/row of
    extra HBM traffic).  Callers that can produce x feature-major should call
    price_prediction_forward_feature_major directly to avoid it.
    """
    assert x.ndim == 2 and x.shape[1] == IN_DIM
    return price_prediction_forward_feature_major(x.T, params, **kwargs)


def init_params(key):
    """Deterministic init mimicking PyTorch nn.Linear: U(-1/sqrt(fan_in), +).

    Weights stay in PyTorch layout (out_features, in_features); biases as
    (out, 1) so they lane-broadcast in the batch-on-lanes kernel layout.
    """
    def linear(k, fan_in, fan_out):
        kw, kb = jax.random.split(k)
        bound = 1.0 / jnp.sqrt(fan_in)
        w = jax.random.uniform(kw, (fan_out, fan_in), jnp.float32, -bound, bound)
        b = jax.random.uniform(kb, (fan_out, 1), jnp.float32, -bound, bound)
        return w, b

    k1, k2, k3 = jax.random.split(key, 3)
    w1, b1 = linear(k1, IN_DIM, H1)
    w2, b2 = linear(k2, H1, H2)
    w3, b3 = linear(k3, H2, OUT_DIM)
    return (w1, b1, w2, b2, w3, b3)


if __name__ == "__main__":
    key = jax.random.PRNGKey(0)
    kp, kx1, kx2 = jax.random.split(key, 3)
    params = init_params(kp)
    w1, b1, w2, b2, w3, b3 = params

    def reference(x):
        # Plain-JAX reference (eval-mode dropout == identity), full f32 matmuls.
        with jax.default_matmul_precision("highest"):
            h = jnp.maximum(x @ w1.T + b1.T, 0.0)
            h = jnp.maximum(h @ w2.T + b2.T, 0.0)
            return h @ w3.T + b3.T

    # Small deterministic batch (single tile).
    x_small = jax.random.normal(kx1, (8, IN_DIM), jnp.float32)
    out_small = price_prediction_forward(x_small, params)
    jax.block_until_ready(out_small)
    assert out_small.shape == (8, OUT_DIM)
    assert jnp.allclose(out_small, reference(x_small), atol=1e-5, rtol=1e-5)

    # Ragged multi-tile batch: exercises the >=2-tile (v7x megacore) grid, the
    # partially-unrolled chunk loop, and the pad/slice handling.
    x_big = jax.random.normal(kx2, (3000, IN_DIM), jnp.float32)
    out_big = price_prediction_forward(x_big, params)
    jax.block_until_ready(out_big)
    assert out_big.shape == (3000, OUT_DIM)
    assert jnp.allclose(out_big, reference(x_big), atol=1e-4, rtol=1e-4)

    # Optional bf16 input path (halves the x HBM read on v6e/v7x); f32 accum.
    out_bf16 = price_prediction_forward(x_big, params,
                                        compute_dtype=jnp.bfloat16)
    jax.block_until_ready(out_bf16)
    assert out_bf16.shape == (3000, OUT_DIM)
    assert jnp.allclose(out_bf16, reference(x_big), atol=5e-2, rtol=5e-2)

    print("KERNEL_OK")
</pallas_src>

<mosaic_0001>
module attributes {stable_mosaic.version = 11 : i64} {
  func.func @mlp_kernel(%arg0: i32, %arg1: memref<5x512xf32, #tpu.memory_space<vmem>>, %arg2: memref<64x5xf32, #tpu.memory_space<vmem>>, %arg3: memref<64x1xf32, #tpu.memory_space<vmem>>, %arg4: memref<32x64xf32, #tpu.memory_space<vmem>>, %arg5: memref<32x1xf32, #tpu.memory_space<vmem>>, %arg6: memref<1x32xf32, #tpu.memory_space<vmem>>, %arg7: memref<1x1xf32, #tpu.memory_space<vmem>>, %arg8: memref<1x512xf32, #tpu.memory_space<vmem>>) attributes {dimension_semantics = [#tpu.dimension_semantics<parallel>], iteration_bounds = array<i64: 1>, scalar_prefetch = 0 : i64, scratch_operands = 0 : i64, tpu.core_type = #tpu.core_type<tc>, window_params = [{transform_indices = @transform_0, window_bounds = array<i64: 5, 512>}, {pipeline_mode = #tpu.pipeline_mode<synchronous>, transform_indices = @transform_1, window_bounds = array<i64: 64, 5>}, {pipeline_mode = #tpu.pipeline_mode<synchronous>, transform_indices = @transform_2, window_bounds = array<i64: 64, 1>}, {pipeline_mode = #tpu.pipeline_mode<synchronous>, transform_indices = @transform_3, window_bounds = array<i64: 32, 64>}, {pipeline_mode = #tpu.pipeline_mode<synchronous>, transform_indices = @transform_4, window_bounds = array<i64: 32, 1>}, {pipeline_mode = #tpu.pipeline_mode<synchronous>, transform_indices = @transform_5, window_bounds = array<i64: 1, 32>}, {pipeline_mode = #tpu.pipeline_mode<synchronous>, transform_indices = @transform_6, window_bounds = array<i64: 1, 1>}, {transform_indices = @transform_7, window_bounds = array<i64: 1, 512>}]} {
    %c0 = arith.constant 0 : index
    %c0_0 = arith.constant 0 : index
    %0 = vector.load %arg2[%c0, %c0_0] : memref<64x5xf32, #tpu.memory_space<vmem>>, vector<64x5xf32>
    %c0_1 = arith.constant 0 : index
    %c0_2 = arith.constant 0 : index
    %1 = vector.load %arg4[%c0_1, %c0_2] : memref<32x64xf32, #tpu.memory_space<vmem>>, vector<32x64xf32>
    %c0_3 = arith.constant 0 : index
    %c0_4 = arith.constant 0 : index
    %2 = vector.load %arg6[%c0_3, %c0_4] : memref<1x32xf32, #tpu.memory_space<vmem>>, vector<1x32xf32>
    %c0_5 = arith.constant 0 : index
    %c0_6 = arith.constant 0 : index
    %3 = vector.load %arg3[%c0_5, %c0_6] : memref<64x1xf32, #tpu.memory_space<vmem>>, vector<64x1xf32>
    %c0_7 = arith.constant 0 : index
    %c0_8 = arith.constant 0 : index
    %4 = vector.load %arg5[%c0_7, %c0_8] : memref<32x1xf32, #tpu.memory_space<vmem>>, vector<32x1xf32>
    %c0_9 = arith.constant 0 : index
    %c0_10 = arith.constant 0 : index
    %5 = vector.load %arg7[%c0_9, %c0_10] : memref<1x1xf32, #tpu.memory_space<vmem>>, vector<1x1xf32>
    %c0_i32 = arith.constant 0 : i32
    %c512_i32 = arith.constant 512 : i32
    %6 = arith.muli %c0_i32, %c512_i32 : i32
    %7 = tpu.assume_multiple %6, 512 : i32
    %c0_11 = arith.constant 0 : index
    %8 = arith.index_cast %7 : i32 to index
    %9 = vector.load %arg1[%c0_11, %8] : memref<5x512xf32, #tpu.memory_space<vmem>>, vector<5x512xf32>
    %cst = arith.constant dense<0.000000e+00> : vector<64x512xf32>
    %10 = tpu.matmul %0, %9, %cst {dimension_numbers = #tpu.dot_dimension_numbers<[1], [0], [0], [1], [0, 0, 1, 1], [], []>} : vector<64x5xf32>, vector<5x512xf32>, vector<64x512xf32> -> vector<64x512xf32>
    %11 = vector.broadcast %3 : vector<64x1xf32> to vector<64x512xf32>
    %12 = arith.addf %10, %11 : vector<64x512xf32>
    %cst_12 = arith.constant 0.000000e+00 : f32
    %13 = vector.broadcast %cst_12 : f32 to vector<64x512xf32>
    %14 = arith.maximumf %12, %13 : vector<64x512xf32>
    %cst_13 = arith.constant dense<0.000000e+00> : vector<32x512xf32>
    %15 = tpu.matmul %1, %14, %cst_13 {dimension_numbers = #tpu.dot_dimension_numbers<[1], [0], [0], [1], [0, 0, 1, 1], [], []>} : vector<32x64xf32>, vector<64x512xf32>, vector<32x512xf32> -> vector<32x512xf32>
    %16 = vector.broadcast %4 : vector<32x1xf32> to vector<32x512xf32>
    %17 = arith.addf %15, %16 : vector<32x512xf32>
    %cst_14 = arith.constant 0.000000e+00 : f32
    %18 = vector.broadcast %cst_14 : f32 to vector<32x512xf32>
    %19 = arith.maximumf %17, %18 : vector<32x512xf32>
    %cst_15 = arith.constant dense<0.000000e+00> : vector<1x512xf32>
    %20 = tpu.matmul %2, %19, %cst_15 {dimension_numbers = #tpu.dot_dimension_numbers<[1], [0], [0], [1], [0, 0, 1, 1], [], []>} : vector<1x32xf32>, vector<32x512xf32>, vector<1x512xf32> -> vector<1x512xf32>
    %21 = vector.broadcast %5 : vector<1x1xf32> to vector<1x512xf32>
    %22 = arith.addf %20, %21 : vector<1x512xf32>
    %c0_16 = arith.constant 0 : index
    %23 = arith.index_cast %7 : i32 to index
    %24 = vector.load %arg8[%c0_16, %23] : memref<1x512xf32, #tpu.memory_space<vmem>>, vector<1x512xf32>
    tpu.vector_store %arg8[%c0_16, %23], %22 {strides = array<i32>} : memref<1x512xf32, #tpu.memory_space<vmem>>, vector<1x512xf32>,
    %c1_i32 = arith.constant 1 : i32
    return
  }
  func.func @transform_0(%arg0: i32) -> (i32, i32) {
    %c0_i32 = arith.constant 0 : i32
    %c0_i32_0 = arith.constant 0 : i32
    return %c0_i32, %arg0 : i32, i32
  }
  func.func @transform_1(%arg0: i32) -> (i32, i32) {
    %c0_i32 = arith.constant 0 : i32
    %c0_i32_0 = arith.constant 0 : i32
    %c0_i32_1 = arith.constant 0 : i32
    return %c0_i32, %c0_i32_0 : i32, i32
  }
  func.func @transform_2(%arg0: i32) -> (i32, i32) {
    %c0_i32 = arith.constant 0 : i32
    %c0_i32_0 = arith.constant 0 : i32
    %c0_i32_1 = arith.constant 0 : i32
    return %c0_i32, %c0_i32_0 : i32, i32
  }
  func.func @transform_3(%arg0: i32) -> (i32, i32) {
    %c0_i32 = arith.constant 0 : i32
    %c0_i32_0 = arith.constant 0 : i32
    %c0_i32_1 = arith.constant 0 : i32
    return %c0_i32, %c0_i32_0 : i32, i32
  }
  func.func @transform_4(%arg0: i32) -> (i32, i32) {
    %c0_i32 = arith.constant 0 : i32
    %c0_i32_0 = arith.constant 0 : i32
    %c0_i32_1 = arith.constant 0 : i32
    return %c0_i32, %c0_i32_0 : i32, i32
  }
  func.func @transform_5(%arg0: i32) -> (i32, i32) {
    %c0_i32 = arith.constant 0 : i32
    %c0_i32_0 = arith.constant 0 : i32
    %c0_i32_1 = arith.constant 0 : i32
    return %c0_i32, %c0_i32_0 : i32, i32
  }
  func.func @transform_6(%arg0: i32) -> (i32, i32) {
    %c0_i32 = arith.constant 0 : i32
    %c0_i32_0 = arith.constant 0 : i32
    %c0_i32_1 = arith.constant 0 : i32
    return %c0_i32, %c0_i32_0 : i32, i32
  }
  func.func @transform_7(%arg0: i32) -> (i32, i32) {
    %c0_i32 = arith.constant 0 : i32
    %c0_i32_0 = arith.constant 0 : i32
    return %c0_i32, %arg0 : i32, i32
  }
}

</mosaic_0001>

<bundles_post_ra>
// kernel: tpu_custom_call.1
= control target key start
LH: loop header
LB: loop body
LE: loop exit
PB: predicated region body
PF: predicated region fallthrough
CT: control target
= control target key end

     0   :  { %s1129_s0 = inlined_call_operand.vmem [shape: f32[5,512], index: 0, kind: input, shape index: {}]   ;;  %s1130_s1 = inlined_call_operand.vmem [shape: f32[64,5], index: 1, kind: input, shape index: {}]   ;;  %s1131_s2 = inlined_call_operand.vmem [shape: f32[64,1], index: 2, kind: input, shape index: {}]   ;;  %s1132_s3 = inlined_call_operand.vmem [shape: f32[32,64], index: 3, kind: input, shape index: {}]   ;;  %s1133_s4 = inlined_call_operand.vmem [shape: f32[32,1], index: 4, kind: input, shape index: {}]   ;;  %s1134_s5 = inlined_call_operand.vmem [shape: f32[1,32], index: 5, kind: input, shape index: {}]   ;;  %s1135_s6 = inlined_call_operand.<no memory space> [shape: f32[1,1], index: 6, kind: input, shape index: {}]   ;;  %s1136_s7 = inlined_call_operand.hbm [shape: f32[1,512], index: 7, kind: output, shape index: {}]  }
   0x1   :  { %v12_v0 = vstv %s1135_s6 }
   0x2   :  { %13 = vst [vmem:[#allocation2] sm:$0x1] %v12_v0 }
   0x3   :  { %v56_v1 = vld [vmem:[%s1129_s0 + $0x8] sm:$0x1f]  ;;  %vm124_vm0 = vcmask 1044480   ;;  %v58_v2 = vld [vmem:[%s1129_s0 + $0x18] sm:$0x1f]  ;;  %v29_v5 = vld [vmem:[%s1130_s1] sm:$0xff] }
   0x4   :  { %825 = vmatprep.subr.msk.mxu0 %vm124_vm0, %v56_v1  ;;  %835 = vmatprep.subr.msk.mxu1 %vm124_vm0, %v58_v2  ;;  %v55_v3 = vld [vmem:[%s1129_s0] sm:$0x1f]  ;;  %v57_v4 = vld [vmem:[%s1129_s0 + $0x10] sm:$0x1f]  ;;  %vm99_vm1 = vcmask 39936   ;;  %v933_v6 = vmov 0.0  }
   0x5   :  { %826 = vmatpush1.msk.msra.mxu0 %vm124_vm0, %v55_v3  ;;  %201 = vmatprep.mubr.f32.mxu0 %v933_v6  ;;  %v42_v7 = vld [vmem:[%s1131_s2] sm:$0xff]  ;;  %v30_v8 = vld [vmem:[%s1130_s1 + $0x8] sm:$0xff]  ;;  %v44_v9 = vld [vmem:[%s1131_s2 + $0x10] sm:$0xff]  ;;  %v934_v10 = vmov 0  }
   0x6   :  { %836 = vmatpush1.msk.msra.mxu1 %vm124_vm0, %v57_v4  ;;  %314 = vmatprep.mubr.f32.mxu1 %v933_v6  ;;  %v43_v11 = vld [vmem:[%s1131_s2 + $0x8] sm:$0xff]  ;;  %v45_v12 = vld [vmem:[%s1131_s2 + $0x18] sm:$0xff] }
   0x7   :  { %827 = vmatmul.mubr.msk.f32.vlgmr.msra.gmra.mrb[0].mxu0 %vm99_vm1, %v29_v5  ;;  %837 = vmatmul.mubr.msk.f32.vlgmr.msra.gmra.mrb[0].mxu1 %vm99_vm1, %v29_v5 }
   0x8   :  { %207 = vmatprep.mubr.f32.mxu0 %v933_v6  ;;  %320 = vmatprep.mubr.f32.mxu1 %v933_v6 }
   0x9   :  { %907 = vset.pattern.permute.xlu0 %v934_v10  ;;  %908 = vset.pattern.permute.xlu1 %v934_v10 }
   0xa   :  { %61 = vperm.xlu0 %907, %v42_v7   ;;  %71 = vperm.xlu1 %908, %v44_v9  }
   0xb   :  { %828 = vmatmul.mubr.msk.f32.gmra.mrb[2].mxu0 %vm99_vm1, %v30_v8  ;;  %838 = vmatmul.mubr.msk.f32.gmra.mrb[2].mxu1 %vm99_vm1, %v30_v8 }
   0xc   :  { %14 = vsyncpa [#allocation4], 0  ;;  %213 = vmatprep.mubr.f32.mxu0 %v933_v6  ;;  %326 = vmatprep.mubr.f32.mxu1 %v933_v6  ;;  %v31_v13 = vld [vmem:[%s1130_s1 + $0x10] sm:$0xff]  ;;  %v46_v14 = vld [vmem:[%s1131_s2 + $0x20] sm:$0xff]  ;;  %vm415_vm2 = vcmask 523264   ;;  %vm631_vm3 = vcmask 261120  }
   0xd   :  { %v47_v15 = vld [vmem:[%s1131_s2 + $0x28] sm:$0xff]  ;;  %v32_v16 = vld [vmem:[%s1130_s1 + $0x18] sm:$0xff]  ;;  %v48_v17 = vld [vmem:[%s1131_s2 + $0x30] sm:$0xff] }
   0xe   :  { %66 = vperm.xlu0 %907, %v43_v11   ;;  %76 = vperm.xlu1 %908, %v45_v12   ;;  %v49_v18 = vld [vmem:[%s1131_s2 + $0x38] sm:$0xff]  ;;  %v33_v19 = vld [vmem:[%s1130_s1 + $0x20] sm:$0xff]  ;;  %v51_v21 = vld [vmem:[%s1133_s4 + $0x8] sm:$0xff] }
   0xf   :  { %829 = vmatmul.mubr.msk.f32.gmra.mrb[4].mxu0 %vm99_vm1, %v31_v13  ;;  %839 = vmatmul.mubr.msk.f32.gmra.mrb[4].mxu1 %vm99_vm1, %v31_v13  ;;  %v50_v20 = vld [vmem:[%s1133_s4] sm:$0xff]  ;;  %v34_v22 = vld [vmem:[%s1130_s1 + $0x28] sm:$0xff]  ;;  %v52_v23 = vld [vmem:[%s1133_s4 + $0x10] sm:$0xff] }
  0x10   :  { %219 = vmatprep.mubr.f32.mxu0 %v933_v6  ;;  %332 = vmatprep.mubr.f32.mxu1 %v933_v6  ;;  %v53_v24 = vld [vmem:[%s1133_s4 + $0x18] sm:$0xff]  ;;  %v35_v25 = vld [vmem:[%s1130_s1 + $0x30] sm:$0xff]  ;;  %v54_v26 = vld [vmem:[#allocation2] sm:$0x1] }
  0x11   :  { %v36_v27 = vld [vmem:[%s1130_s1 + $0x38] sm:$0xff] }
  0x12   :  { %81 = vperm.xlu0 %907, %v46_v14   ;;  %86 = vperm.xlu1 %908, %v47_v15  }
  0x13   :  { %830 = vmatmul.mubr.msk.f32.gmra.mrb[6].mxu0 %vm99_vm1, %v32_v16  ;;  %840 = vmatmul.mubr.msk.f32.gmra.mrb[6].mxu1 %vm99_vm1, %v32_v16 }
  0x14   :  { %225 = vmatprep.mubr.f32.mxu0 %v933_v6  ;;  %338 = vmatprep.mubr.f32.mxu1 %v933_v6 }
  0x16   :  { %91 = vperm.xlu0 %907, %v48_v17   ;;  %96 = vperm.xlu1 %908, %v49_v18  }
  0x17   :  { %831 = vmatmul.mubr.msk.f32.gmra.mrb[8].mxu0 %vm99_vm1, %v33_v19  ;;  %841 = vmatmul.mubr.msk.f32.gmra.mrb[8].mxu1 %vm99_vm1, %v33_v19 }
  0x18   :  { %231 = vmatprep.mubr.f32.mxu0 %v933_v6  ;;  %344 = vmatprep.mubr.f32.mxu1 %v933_v6 }
  0x1a   :  { %397 = vperm.xlu0 %907, %v50_v20   ;;  %402 = vperm.xlu1 %908, %v51_v21  }
  0x1b   :  { %832 = vmatmul.mubr.msk.f32.gmra.mrb[10].mxu0 %vm99_vm1, %v34_v22  ;;  %842 = vmatmul.mubr.msk.f32.gmra.mrb[10].mxu1 %vm99_vm1, %v34_v22 }
  0x1c   :  { %237 = vmatprep.mubr.f32.mxu0 %v933_v6  ;;  %350 = vmatprep.mubr.f32.mxu1 %v933_v6 }
  0x1e   :  { %407 = vperm.xlu0 %907, %v52_v23   ;;  %412 = vperm.xlu1 %908, %v53_v24  }
  0x1f   :  { %833 = vmatmul.mubr.msk.f32.gmra.mrb[12].mxu0 %vm99_vm1, %v35_v25  ;;  %843 = vmatmul.mubr.msk.f32.gmra.mrb[12].mxu1 %vm99_vm1, %v35_v25 }
  0x20   :  { %243 = vmatprep.mubr.f32.mxu0 %v933_v6  ;;  %356 = vmatprep.mubr.f32.mxu1 %v933_v6 }
  0x22   :  { %624 = vperm.xlu0 %907, %v54_v26  }
  0x23   :  { %834 = vmatmul.mubr.msk.f32.gmra.mrb[14].mxu0 %vm99_vm1, %v36_v27  ;;  %844 = vmatmul.mubr.msk.f32.gmra.mrb[14].mxu1 %vm99_vm1, %v36_v27 }
  0x24   :  { %492 = vmatprep.mubr.f32.mxu0 %v933_v6  ;;  %581 = vmatprep.mubr.f32.mxu1 %v933_v6 }
  0x89   :  { %v62_v28 = vpop.permute.xlu0 %61  ;;  %v72_v34 = vpop.permute.xlu1 %71 }
  0x8d   :  { %v67_v33 = vpop.permute.xlu0 %66  ;;  %v77_v63 = vpop.permute.xlu1 %76 }
  0x91   :  { %v82_v27 = vpop.permute.xlu0 %81 }
  0xda   :  { %v203_v29 = vpop.f32.mrb[0].mxu0  ;;  %v316_v30 = vpop.f32.mrb[0].mxu1 }
  0xdb   :  { %v205_v31 = vpop.f32.mrb[1].mxu0  ;;  %v318_v32 = vpop.f32.mrb[1].mxu1  ;;  %v204_v35 = vadd.f32 %v203_v29, %v62_v28  ;;  %v317_v36 = vadd.f32 %v316_v30, %v62_v28 }
  0xdc   :  { %v206_v37 = vadd.f32 %v205_v31, %v62_v28  ;;  %v319_v38 = vadd.f32 %v318_v32, %v62_v28  ;;  %v87_v30 = vpop.permute.xlu1 %86 }
  0xdd   :  { %v363_v47 = vmax.f32 %v204_v35, 0.0  ;;  %v365_v48 = vmax.f32 %v317_v36, 0.0 }
  0xde   :  { %v209_v39 = vpop.f32.mrb[2].mxu0  ;;  %v322_v40 = vpop.f32.mrb[2].mxu1  ;;  %v364_v51 = vmax.f32 %v206_v37, 0.0  ;;  %v366_v52 = vmax.f32 %v319_v38, 0.0 }
  0xdf   :  { %v210_v41 = vadd.f32 %v209_v39, %v67_v33  ;;  %v323_v42 = vadd.f32 %v322_v40, %v67_v33  ;;  %v211_v43 = vpop.f32.mrb[3].mxu0  ;;  %v324_v44 = vpop.f32.mrb[3].mxu1 }
  0xe0   :  { %v212_v45 = vadd.f32 %v211_v43, %v67_v33  ;;  %v325_v46 = vadd.f32 %v324_v44, %v67_v33 }
  0xe1   :  { %v367_v49 = vmax.f32 %v210_v41, 0.0  ;;  %v369_v50 = vmax.f32 %v323_v42, 0.0 }
  0xe2   :  { %v368_v53 = vmax.f32 %v212_v45, 0.0  ;;  %v370_v54 = vmax.f32 %v325_v46, 0.0  ;;  %v215_v55 = vpop.f32.mrb[4].mxu0  ;;  %v328_v56 = vpop.f32.mrb[4].mxu1 }
  0xe3   :  { %v857_v57 = vpack.c.bf16 %v367_v49, %v363_v47  ;;  %v873_v58 = vpack.c.bf16 %v369_v50, %v365_v48  ;;  %v217_v59 = vpop.f32.mrb[5].mxu0  ;;  %v330_v60 = vpop.f32.mrb[5].mxu1  ;;  %v216_v0 = vadd.f32 %v215_v55, %v72_v34  ;;  %v329_v1 = vadd.f32 %v328_v56, %v72_v34 }
  0xe4   :  { %v855_v61 = vpack.c.bf16 %v368_v53, %v364_v51  ;;  %v871_v62 = vpack.c.bf16 %v370_v54, %v366_v52  ;;  %v218_v2 = vadd.f32 %v217_v59, %v72_v34  ;;  %v331_v3 = vadd.f32 %v330_v60, %v72_v34  ;;  %v97_v60 = vpop.permute.xlu1 %96 }
  0xe5   :  { %v371_v13 = vmax.f32 %v216_v0, 0.0  ;;  %v373_v14 = vmax.f32 %v329_v1, 0.0 }
  0xe6   :  { %v221_v4 = vpop.f32.mrb[6].mxu0  ;;  %v334_v5 = vpop.f32.mrb[6].mxu1  ;;  %856 = vmatprep.subr.bf16.mxu0 %v855_v61  ;;  %872 = vmatprep.subr.bf16.mxu1 %v871_v62  ;;  %v372_v17 = vmax.f32 %v218_v2, 0.0  ;;  %v374_v18 = vmax.f32 %v331_v3, 0.0 }
  0xe7   :  { %v222_v7 = vadd.f32 %v221_v4, %v77_v63  ;;  %v335_v8 = vadd.f32 %v334_v5, %v77_v63  ;;  %v223_v9 = vpop.f32.mrb[7].mxu0  ;;  %v336_v10 = vpop.f32.mrb[7].mxu1  ;;  %858 = vmatpush1.bf16.msra.mxu0 %v857_v57  ;;  %874 = vmatpush1.bf16.msra.mxu1 %v873_v58 }
  0xe8   :  { %v224_v11 = vadd.f32 %v223_v9, %v77_v63  ;;  %v337_v12 = vadd.f32 %v336_v10, %v77_v63  ;;  %v92_v57 = vpop.permute.xlu0 %91 }
  0xe9   :  { %v375_v15 = vmax.f32 %v222_v7, 0.0  ;;  %v377_v16 = vmax.f32 %v335_v8, 0.0 }
  0xea   :  { %v376_v19 = vmax.f32 %v224_v11, 0.0  ;;  %v378_v20 = vmax.f32 %v337_v12, 0.0  ;;  %v227_v21 = vpop.f32.mrb[8].mxu0  ;;  %v340_v22 = vpop.f32.mrb[8].mxu1 }
  0xeb   :  { %v861_v23 = vpack.c.bf16 %v375_v15, %v371_v13  ;;  %v877_v24 = vpack.c.bf16 %v377_v16, %v373_v14  ;;  %v229_v25 = vpop.f32.mrb[9].mxu0  ;;  %v342_v26 = vpop.f32.mrb[9].mxu1  ;;  %v228_v31 = vadd.f32 %v227_v21, %v82_v27  ;;  %v341_v32 = vadd.f32 %v340_v22, %v82_v27  ;;  %v37_v22 = vld [vmem:[%s1132_s3] sm:$0xff] }
  0xec   :  { %v859_v28 = vpack.c.bf16 %v376_v19, %v372_v17  ;;  %v875_v29 = vpack.c.bf16 %v378_v20, %v374_v18  ;;  %v230_v33 = vadd.f32 %v229_v25, %v82_v27  ;;  %v343_v34 = vadd.f32 %v342_v26, %v82_v27  ;;  %v40_v25 = vld [vmem:[%s1132_s3 + $0x18] sm:$0xff] }
  0xed   :  { %v379_v43 = vmax.f32 %v228_v31, 0.0  ;;  %v381_v44 = vmax.f32 %v341_v32, 0.0  ;;  %v403_v31 = vpop.permute.xlu1 %402 }
  0xee   :  { %v233_v35 = vpop.f32.mrb[10].mxu0  ;;  %v346_v36 = vpop.f32.mrb[10].mxu1  ;;  %860 = vmatprep.subr.bf16.mxu0 %v859_v28  ;;  %876 = vmatprep.subr.bf16.mxu1 %v875_v29  ;;  %v380_v47 = vmax.f32 %v230_v33, 0.0  ;;  %v382_v48 = vmax.f32 %v343_v34, 0.0 }
  0xef   :  { %v234_v37 = vadd.f32 %v233_v35, %v87_v30  ;;  %v347_v38 = vadd.f32 %v346_v36, %v87_v30  ;;  %v235_v39 = vpop.f32.mrb[11].mxu0  ;;  %v348_v40 = vpop.f32.mrb[11].mxu1  ;;  %862 = vmatpush1.bf16.msra.mxu0 %v861_v23  ;;  %878 = vmatpush1.bf16.msra.mxu1 %v877_v24  ;;  %v38_v23 = vld [vmem:[%s1132_s3 + $0x8] sm:$0xff]  ;;  %v39_v24 = vld [vmem:[%s1132_s3 + $0x10] sm:$0xff] }
  0xf0   :  { %v236_v41 = vadd.f32 %v235_v39, %v87_v30  ;;  %v349_v42 = vadd.f32 %v348_v40, %v87_v30  ;;  %v398_v30 = vpop.permute.xlu0 %397 }
  0xf1   :  { %v383_v45 = vmax.f32 %v234_v37, 0.0  ;;  %v385_v46 = vmax.f32 %v347_v38, 0.0 }
  0xf2   :  { %v384_v49 = vmax.f32 %v236_v41, 0.0  ;;  %v386_v50 = vmax.f32 %v349_v42, 0.0  ;;  %v239_v51 = vpop.f32.mrb[12].mxu0  ;;  %v352_v52 = vpop.f32.mrb[12].mxu1 }
  0xf3   :  { %v865_v53 = vpack.c.bf16 %v383_v45, %v379_v43  ;;  %v881_v54 = vpack.c.bf16 %v385_v46, %v381_v44  ;;  %v241_v55 = vpop.f32.mrb[13].mxu0  ;;  %v354_v56 = vpop.f32.mrb[13].mxu1  ;;  %v240_v61 = vadd.f32 %v239_v51, %v92_v57  ;;  %v353_v62 = vadd.f32 %v352_v52, %v92_v57 }
  0xf4   :  { %v863_v58 = vpack.c.bf16 %v384_v49, %v380_v47  ;;  %v879_v59 = vpack.c.bf16 %v386_v50, %v382_v48  ;;  %v242_v63 = vadd.f32 %v241_v55, %v92_v57  ;;  %v355_v0 = vadd.f32 %v354_v56, %v92_v57  ;;  %v408_v57 = vpop.permute.xlu0 %407 }
  0xf5   :  { %v387_v10 = vmax.f32 %v240_v61, 0.0  ;;  %v389_v11 = vmax.f32 %v353_v62, 0.0 }
  0xf6   :  { %v245_v1 = vpop.f32.mrb[14].mxu0  ;;  %v358_v2 = vpop.f32.mrb[14].mxu1  ;;  %864 = vmatprep.subr.bf16.mxu0 %v863_v58  ;;  %880 = vmatprep.subr.bf16.mxu1 %v879_v59  ;;  %v388_v14 = vmax.f32 %v242_v63, 0.0  ;;  %v390_v15 = vmax.f32 %v355_v0, 0.0 }
  0xf7   :  { %v246_v3 = vadd.f32 %v245_v1, %v97_v60  ;;  %v359_v4 = vadd.f32 %v358_v2, %v97_v60  ;;  %v247_v5 = vpop.f32.mrb[15].mxu0  ;;  %v360_v7 = vpop.f32.mrb[15].mxu1  ;;  %866 = vmatpush1.bf16.msra.mxu0 %v865_v53  ;;  %882 = vmatpush1.bf16.msra.mxu1 %v881_v54 }
  0xf8   :  { %v248_v8 = vadd.f32 %v247_v5, %v97_v60  ;;  %v361_v9 = vadd.f32 %v360_v7, %v97_v60  ;;  %v413_v60 = vpop.permute.xlu1 %412 }
  0xf9   :  { %v391_v12 = vmax.f32 %v246_v3, 0.0  ;;  %v393_v13 = vmax.f32 %v359_v4, 0.0 }
  0xfa   :  { %v392_v16 = vmax.f32 %v248_v8, 0.0  ;;  %v394_v17 = vmax.f32 %v361_v9, 0.0 }
  0xfb   :  { %v869_v18 = vpack.c.bf16 %v391_v12, %v387_v10  ;;  %v885_v19 = vpack.c.bf16 %v393_v13, %v389_v11 }
  0xfc   :  { %v867_v20 = vpack.c.bf16 %v392_v16, %v388_v14  ;;  %v883_v21 = vpack.c.bf16 %v394_v17, %v390_v15 }
  0xfe   :  { %868 = vmatprep.subr.bf16.mxu0 %v867_v20  ;;  %884 = vmatprep.subr.bf16.mxu1 %v883_v21 }
  0xff   :  { %870 = vmatpush1.bf16.msra.mxu0 %v869_v18  ;;  %886 = vmatpush1.bf16.msra.mxu1 %v885_v19 }
 0x102   :  { %845 = vmatmul.mubr.msk.f32.vlgmr.msra.gmra.mrb[16].mxu0 %vm415_vm2, %v37_v22  ;;  %849 = vmatmul.mubr.msk.f32.vlgmr.msra.gmra.mrb[16].mxu1 %vm415_vm2, %v37_v22  ;;  %v41_v22 = vld [vmem:[%s1134_s5] sm:$0x1]  ;;  %s936_s5 = smov [#allocation3]  }
 0x103   :  { %498 = vmatprep.mubr.f32.mxu0 %v933_v6  ;;  %587 = vmatprep.mubr.f32.mxu1 %v933_v6  ;;  %s817_s30 = sshll.u32 %s936_s5, 4  ;;  %s818_s30 = int_to_ptr.vmem [resolvable:$true] %s817_s30 }
 0x104   :  { %s909_s8 = scalar_lea.vmem %s818_s30, 64  ;;  %p914_p1 = scmp.lt.s32.totalorder %s818_s30, %s818_s30 }
 0x105   :  { %p910_p0 = scmp.ne.s32.totalorder %s818_s30, %s909_s8  ;;  %p915_p2 = scmp.lt.s32.totalorder %s909_s8, %s909_s8 }
 0x106   :  { %846 = vmatmul.mubr.msk.f32.gmra.mrb[18].mxu0 %vm415_vm2, %v38_v23  ;;  %850 = vmatmul.mubr.msk.f32.gmra.mrb[18].mxu1 %vm415_vm2, %v38_v23  ;;  %v627_v23 = vlaneseq }
 0x107   :  { %504 = vmatprep.mubr.f32.mxu0 %v933_v6  ;;  %593 = vmatprep.mubr.f32.mxu1 %v933_v6  ;;  %p916_p3 = por %p915_p2, %p914_p1 }
 0x108   :  { %vm808_vm4 = vcmp.lt.s32.totalorder %v627_v23, 512 }
 0x109   :  { %p917_p4 = pnand %p916_p3, %p910_p0 }
 0x10a   :  { %847 = vmatmul.mubr.msk.f32.gmra.mrb[20].mxu0 %vm415_vm2, %v39_v24  ;;  %851 = vmatmul.mubr.msk.f32.gmra.mrb[20].mxu1 %vm415_vm2, %v39_v24  ;;  %v628_v24 = vshrl.u32 %v627_v23, 7 }
 0x10b   :  { %510 = vmatprep.mubr.f32.mxu0 %v933_v6  ;;  %599 = vmatprep.mubr.f32.mxu1 %v933_v6 }
 0x10e   :  { %848 = vmatmul.mubr.msk.f32.gmra.mrb[22].mxu0 %vm415_vm2, %v40_v25  ;;  %852 = vmatmul.mubr.msk.f32.gmra.mrb[22].mxu1 %vm415_vm2, %v40_v25  ;;  %v935_v25 = vmov 1966171168  }
 0x10f   :  { %699 = vmatprep.mubr.f32.mxu0 %v933_v6  ;;  %770 = vmatprep.mubr.f32.mxu1 %v933_v6 }
 0x1d5   :  { %v494_v26 = vpop.f32.mrb[16].mxu0  ;;  %v583_v27 = vpop.f32.mrb[16].mxu1 }
 0x1d6   :  { %v496_v28 = vpop.f32.mrb[17].mxu0  ;;  %v585_v29 = vpop.f32.mrb[17].mxu1  ;;  %v495_v32 = vadd.f32 %v494_v26, %v398_v30  ;;  %v584_v33 = vadd.f32 %v583_v27, %v398_v30  ;;  %v784_v26 = vunpack.c.l.s4 %v935_v25  ;;  %v629_v27 = vsub.s32 0, %v628_v24 }
 0x1d7   :  { %v497_v34 = vadd.f32 %v496_v28, %v398_v30  ;;  %v586_v35 = vadd.f32 %v585_v29, %v398_v30  ;;  %v625_v28 = vpop.permute.xlu0 %624 }
 0x1d8   :  { %v606_v44 = vmax.f32 %v495_v32, 0.0  ;;  %v608_v6 = vmax.f32 %v584_v33, 0.0  ;;  %v785_v29 = vunpack.c.0.s8 %v784_v26  ;;  %v630_v30 = vrot.slane %v625_v28, %v629_v27 }
 0x1d9   :  { %v500_v36 = vpop.f32.mrb[18].mxu0  ;;  %v589_v37 = vpop.f32.mrb[18].mxu1  ;;  %v607_v47 = vmax.f32 %v497_v34, 0.0  ;;  %v609_v48 = vmax.f32 %v586_v35, 0.0 }
 0x1da   :  { %v501_v38 = vadd.f32 %v500_v36, %v403_v31  ;;  %v590_v39 = vadd.f32 %v589_v37, %v403_v31  ;;  %v502_v40 = vpop.f32.mrb[19].mxu0  ;;  %v591_v41 = vpop.f32.mrb[19].mxu1  ;;  %v788_v37 = vsub.s32 %v785_v29, %v628_v24 }
 0x1db   :  { %v503_v42 = vadd.f32 %v502_v40, %v403_v31  ;;  %v592_v43 = vadd.f32 %v591_v41, %v403_v31 }
 0x1dc   :  { %v610_v45 = vmax.f32 %v501_v38, 0.0  ;;  %v612_v46 = vmax.f32 %v590_v39, 0.0 }
 0x1dd   :  { %v611_v49 = vmax.f32 %v503_v42, 0.0  ;;  %v613_v50 = vmax.f32 %v592_v43, 0.0  ;;  %v506_v51 = vpop.f32.mrb[20].mxu0  ;;  %v595_v52 = vpop.f32.mrb[20].mxu1 }
 0x1de   :  { %v889_v53 = vpack.c.bf16 %v610_v45, %v606_v44  ;;  %v897_v54 = vpack.c.bf16 %v612_v46, %v608_v6  ;;  %v508_v55 = vpop.f32.mrb[21].mxu0  ;;  %v597_v56 = vpop.f32.mrb[21].mxu1  ;;  %v507_v61 = vadd.f32 %v506_v51, %v408_v57  ;;  %v596_v62 = vadd.f32 %v595_v52, %v408_v57 }
 0x1df   :  { %v887_v58 = vpack.c.bf16 %v611_v49, %v607_v47  ;;  %v895_v59 = vpack.c.bf16 %v613_v50, %v609_v48  ;;  %v509_v63 = vadd.f32 %v508_v55, %v408_v57  ;;  %v598_v0 = vadd.f32 %v597_v56, %v408_v57 }
 0x1e0   :  { %v614_v10 = vmax.f32 %v507_v61, 0.0  ;;  %v616_v11 = vmax.f32 %v596_v62, 0.0 }
 0x1e1   :  { %v512_v1 = vpop.f32.mrb[22].mxu0  ;;  %v601_v2 = vpop.f32.mrb[22].mxu1  ;;  %888 = vmatprep.subr.bf16.mxu0 %v887_v58  ;;  %896 = vmatprep.subr.bf16.mxu1 %v895_v59  ;;  %v615_v14 = vmax.f32 %v509_v63, 0.0  ;;  %v617_v15 = vmax.f32 %v598_v0, 0.0 }
 0x1e2   :  { %v513_v3 = vadd.f32 %v512_v1, %v413_v60  ;;  %v602_v4 = vadd.f32 %v601_v2, %v413_v60  ;;  %v514_v5 = vpop.f32.mrb[23].mxu0  ;;  %v603_v7 = vpop.f32.mrb[23].mxu1  ;;  %890 = vmatpush1.bf16.msra.mxu0 %v889_v53  ;;  %898 = vmatpush1.bf16.msra.mxu1 %v897_v54 }
 0x1e3   :  { %v515_v8 = vadd.f32 %v514_v5, %v413_v60  ;;  %v604_v9 = vadd.f32 %v603_v7, %v413_v60 }
 0x1e4   :  { %v618_v12 = vmax.f32 %v513_v3, 0.0  ;;  %v620_v13 = vmax.f32 %v602_v4, 0.0 }
 0x1e5   :  { %v619_v16 = vmax.f32 %v515_v8, 0.0  ;;  %v621_v17 = vmax.f32 %v604_v9, 0.0 }
 0x1e6   :  { %v893_v18 = vpack.c.bf16 %v618_v12, %v614_v10  ;;  %v901_v19 = vpack.c.bf16 %v620_v13, %v616_v11 }
 0x1e7   :  { %v891_v20 = vpack.c.bf16 %v619_v16, %v615_v14  ;;  %v899_v21 = vpack.c.bf16 %v621_v17, %v617_v15 }
 0x1e9   :  { %892 = vmatprep.subr.bf16.mxu0 %v891_v20  ;;  %900 = vmatprep.subr.bf16.mxu1 %v899_v21 }
 0x1ea   :  { %894 = vmatpush1.bf16.msra.mxu0 %v893_v18  ;;  %902 = vmatpush1.bf16.msra.mxu1 %v901_v19 }
 0x1ed   :  { %853 = vmatmul.mubr.msk.f32.vlgmr.msra.gmra.mrb[24].mxu0 %vm631_vm3, %v41_v22  ;;  %854 = vmatmul.mubr.msk.f32.vlgmr.msra.gmra.mrb[24].mxu1 %vm631_vm3, %v41_v22 }
 0x2c0   :  { %v701_v31 = vpop.f32.mrb[24].mxu0  ;;  %v772_v32 = vpop.f32.mrb[24].mxu1 }
 0x2c1   :  { %v702_v33 = vadd.f32 %v701_v31, %v630_v30  ;;  %v773_v34 = vadd.f32 %v772_v32, %v630_v30  ;;  %v703_v35 = vpop.f32.mrb[25].mxu0  ;;  %v774_v36 = vpop.f32.mrb[25].mxu1 }
 0x2c2   :  { %v704_v38 = vadd.f32 %v703_v35, %v630_v30  ;;  %v775_v39 = vadd.f32 %v774_v36, %v630_v30 }
 0x2c4   :  { %v781_v40 = vcombine.low %v702_v33, %v704_v38  ;;  %v782_v41 = vcombine.low %v773_v34, %v775_v39 }
 0x2c6   :  { %v789_v42 = vrot.slane %v781_v40, %v788_v37  ;;  %v796_v43 = vrot.slane %v782_v41, %v788_v37 }
 0x2c8   :  { %v797_v44 = vcombine.low %v789_v42, %v796_v43 }
 0x2ca   :  { %v804_v6 = vrot.slane %v797_v44, %v788_v37 }
 0x2cc   :  { %810 = vst.msk [vmem:[#allocation3] sm:$0xf] %vm808_vm4, %v804_v6 }
 0x2cd   :  { %920 = shalt.err (!%p917_p4)
}
 0x2ce   :  { %s921_s6 = scalar_lea.hbm %s1136_s7, 64 }
 0x2cf   :  { %p922_p5 = scmp.ne.s32.totalorder %s1136_s7, %s921_s6  ;;  %p925_p6 = scmp.lt.u32.totalorder %s921_s6, %s1136_s7 }
 0x2d1   :  { %p927_p7 = pnand %p925_p6, %p922_p5 }
 0x2d3   :  { %930 = shalt.err (!%p927_p7)
}
 0x2d4   :  { %820 = dma.vmem_to_hbm [thread:$0]  %s818_s30, 64, %s1136_s7, [#allocation4]  }
 0x2d5   :  { %931 = dma.done.wait [#allocation4], 64  }
 0x2d6   :  { %932 = vsyncadd [#allocation4], 4294967232 }
 0x2d7   :  { %824 = vsyncpa [#allocation4], 1 }

</bundles_post_ra>
